<compile_context>
chip_gen: v7x
topology: tpu7x:2x2x1
jax: 0.10.0
libtpu: 0.0.40
codegen_flags: <defaults>
</compile_context>

<pallas_src>
import jax
import jax.numpy as jnp
from jax.experimental import pallas as pl
from jax.experimental.pallas import tpu as pltpu


def _pooler_kernel_aligned(fwd_ref, bwd_ref, o_ref):
    # fwd_ref: (TB, nhid)   forward-direction slab at t = T-1
    # bwd_ref: (TB, nhid)   backward-direction slab at t = 0
    # o_ref:   (TB, 2*nhid) output row block
    nhid = fwd_ref.shape[-1]
    # Two lane-aligned, unmasked slice stores (nhid % 128 == 0 on this path).
    o_ref[:, :nhid] = fwd_ref[...]
    o_ref[:, nhid:] = bwd_ref[...]


def _pooler_kernel_unaligned(fwd_ref, bwd_ref, o_ref):
    # fwd_ref/bwd_ref: (TB, 1, nhid) slabs gathered from the (T, B, 2, nhid) view.
    # o_ref: (TB, 2, nhid) -> full-last-dim, lane-dense stores, no lane shuffles.
    o_ref[:, 0, :] = fwd_ref[:, 0, :]
    o_ref[:, 1, :] = bwd_ref[:, 0, :]


def _pick_batch_tile(B, nhid, dtype, aligned):
    """VMEM-budget- and dtype-aware batch tile size."""
    itemsize = jnp.dtype(dtype).itemsize
    # Packed-sublane granularity: 8 rows for 32-bit, 16 for bf16, 32 for 8-bit.
    gran = 8 if itemsize >= 4 else (16 if itemsize == 2 else 32)
    # Double-buffered VMEM bytes per batch row:
    #   aligned:   2 inputs * nhid + 1 output * 2*nhid          -> 4*nhid / row
    #   unaligned: unit-direction blocks pad to 8 sublanes      -> 24*nhid / row (conservative)
    per_row = (4 if aligned else 24) * 2 * nhid * itemsize
    budget = 12 << 20  # below every scoped-VMEM default (v5e 16 MiB, v6e/v7x 32 MiB)
    tb = min(512, max(1, budget // max(per_row, 1)))
    tb = max(gran, (tb // gran) * gran)
    if tb >= B:
        slab_bytes = 2 * B * nhid * itemsize
        if slab_bytes > (4 << 20) and B >= 2 * gran:
            # Large slab: keep >= 2 grid steps so the "parallel" batch axis can
            # actually be sharded across the two v7x TensorCores.
            tb = max(gran, (((B + 1) // 2) // gran) * gran)
        else:
            tb = B
    return tb


def rnn_pooler(output, bsz, nhid):
    """output: (T, bsz, 2*nhid) time-major bidirectional RNN output -> (bsz, 2*nhid)."""
    T, B, H2 = output.shape
    assert B == bsz and H2 == 2 * nhid

    aligned = (nhid % 128 == 0)
    TB = _pick_batch_tile(B, nhid, output.dtype, aligned)
    grid = (pl.cdiv(B, TB),)
    itemsize = jnp.dtype(output.dtype).itemsize
    # Both paths: read 2*B*nhid + write 2*B*nhid elements.
    cost = pl.CostEstimate(
        flops=0, transcendentals=0, bytes_accessed=4 * B * nhid * itemsize
    )
    params = pltpu.CompilerParams(dimension_semantics=("parallel",))

    if aligned:
        in_specs = [
            # forward half: timestep T-1, column block 0 -> cols [0, nhid)
            pl.BlockSpec((pl.Squeezed(), TB, nhid), lambda i: (T - 1, i, 0)),
            # backward half: timestep 0, column block 1 -> cols [nhid, 2*nhid)
            pl.BlockSpec((pl.Squeezed(), TB, nhid), lambda i: (0, i, 1)),
        ]
        return pl.pallas_call(
            _pooler_kernel_aligned,
            grid=grid,
            in_specs=in_specs,
            out_specs=pl.BlockSpec((TB, H2), lambda i: (i, 0)),
            out_shape=jax.ShapeDtypeStruct((B, H2), output.dtype),
            compiler_params=params,
            cost_estimate=cost,
        )(output, output)

    # nhid not lane-aligned: view as (T, B, 2, nhid) (free row-major
    # reinterpretation) so each direction is an nhid-wide slab whose last dim
    # equals the full array dim -> nhid-only reads, lane-dense stores.
    x4 = output.reshape(T, B, 2, nhid)
    in_specs = [
        # forward dir (index 0) at timestep T-1
        pl.BlockSpec((pl.Squeezed(), TB, 1, nhid), lambda i: (T - 1, i, 0, 0)),
        # backward dir (index 1) at timestep 0
        pl.BlockSpec((pl.Squeezed(), TB, 1, nhid), lambda i: (0, i, 1, 0)),
    ]
    out = pl.pallas_call(
        _pooler_kernel_unaligned,
        grid=grid,
        in_specs=in_specs,
        out_specs=pl.BlockSpec((TB, 2, nhid), lambda i: (i, 0, 0)),
        out_shape=jax.ShapeDtypeStruct((B, 2, nhid), output.dtype),
        compiler_params=params,
        cost_estimate=cost,
    )(x4, x4)
    # Free metadata reshape back to the PyTorch (bsz, 2*nhid) layout.
    return out.reshape(B, H2)


if __name__ == "__main__":
    # Small shapes consistent with the module: time-major bidirectional output.
    T, bsz, nhid = 8, 8, 128  # (seq=8, batch=8, hidden=128)

    key = jax.random.PRNGKey(0)
    output = jax.random.normal(key, (T, bsz, 2 * nhid), dtype=jnp.float32)

    result = jax.block_until_ready(rnn_pooler(output, bsz, nhid))

    # Pure-JAX reference of the PyTorch forward.
    unpacked = output.reshape(T, bsz, 2, nhid)
    ref = jnp.concatenate((unpacked[-1, :, 0, :], unpacked[0, :, 1, :]), axis=1)
    assert result.shape == (bsz, 2 * nhid)
    assert jnp.array_equal(result, ref), "aligned path does not match reference"

    # Also exercise the unaligned-nhid fallback path (nhid % 128 != 0).
    T2, b2, nh2 = 4, 8, 96
    out2 = jax.random.normal(jax.random.PRNGKey(0), (T2, b2, 2 * nh2), dtype=jnp.float32)
    res2 = jax.block_until_ready(rnn_pooler(out2, b2, nh2))
    up2 = out2.reshape(T2, b2, 2, nh2)
    ref2 = jnp.concatenate((up2[-1, :, 0, :], up2[0, :, 1, :]), axis=1)
    assert res2.shape == (b2, 2 * nh2)
    assert jnp.array_equal(res2, ref2), "unaligned path does not match reference"

    print("KERNEL_OK")
</pallas_src>

<mosaic_0001>
module attributes {stable_mosaic.version = 11 : i64} {
  func.func @_pooler_kernel_aligned(%arg0: i32, %arg1: memref<1x8x128xf32, #tpu.memory_space<vmem>>, %arg2: memref<1x8x128xf32, #tpu.memory_space<vmem>>, %arg3: memref<8x256xf32, #tpu.memory_space<vmem>>) attributes {dimension_semantics = [#tpu.dimension_semantics<parallel>], iteration_bounds = array<i64: 1>, scalar_prefetch = 0 : i64, scratch_operands = 0 : i64, tpu.core_type = #tpu.core_type<tc>, window_params = [{transform_indices = @transform_0, window_bounds = array<i64: 1, 8, 128>}, {transform_indices = @transform_1, window_bounds = array<i64: 1, 8, 128>}, {transform_indices = @transform_2, window_bounds = array<i64: 8, 256>}]} {
    %c0 = arith.constant 0 : index
    %c0_0 = arith.constant 0 : index
    %c0_1 = arith.constant 0 : index
    %0 = vector.load %arg1[%c0, %c0_0, %c0_1] : memref<1x8x128xf32, #tpu.memory_space<vmem>>, vector<1x8x128xf32>
    %1 = vector.shape_cast %0 : vector<1x8x128xf32> to vector<8x128xf32>
    %c0_2 = arith.constant 0 : index
    %c0_3 = arith.constant 0 : index
    %2 = vector.load %arg3[%c0_2, %c0_3] : memref<8x256xf32, #tpu.memory_space<vmem>>, vector<8x128xf32>
    tpu.vector_store %arg3[%c0_2, %c0_3], %1 {strides = array<i32>} : memref<8x256xf32, #tpu.memory_space<vmem>>, vector<8x128xf32>,
    %c0_4 = arith.constant 0 : index
    %c0_5 = arith.constant 0 : index
    %c0_6 = arith.constant 0 : index
    %3 = vector.load %arg2[%c0_4, %c0_5, %c0_6] : memref<1x8x128xf32, #tpu.memory_space<vmem>>, vector<1x8x128xf32>
    %4 = vector.shape_cast %3 : vector<1x8x128xf32> to vector<8x128xf32>
    %c0_7 = arith.constant 0 : index
    %c128 = arith.constant 128 : index
    %5 = vector.load %arg3[%c0_7, %c128] : memref<8x256xf32, #tpu.memory_space<vmem>>, vector<8x128xf32>
    tpu.vector_store %arg3[%c0_7, %c128], %4 {strides = array<i32>} : memref<8x256xf32, #tpu.memory_space<vmem>>, vector<8x128xf32>,
    return
  }
  func.func @transform_0(%arg0: i32) -> (i32, i32, i32) {
    %c7_i32 = arith.constant 7 : i32
    %c0_i32 = arith.constant 0 : i32
    %c0_i32_0 = arith.constant 0 : i32
    return %c7_i32, %arg0, %c0_i32 : i32, i32, i32
  }
  func.func @transform_1(%arg0: i32) -> (i32, i32, i32) {
    %c0_i32 = arith.constant 0 : i32
    %c1_i32 = arith.constant 1 : i32
    %c0_i32_0 = arith.constant 0 : i32
    return %c0_i32, %arg0, %c1_i32 : i32, i32, i32
  }
  func.func @transform_2(%arg0: i32) -> (i32, i32) {
    %c0_i32 = arith.constant 0 : i32
    %c0_i32_0 = arith.constant 0 : i32
    return %arg0, %c0_i32 : i32, i32
  }
}

</mosaic_0001>

<bundles_post_ra>
// kernel: tpu_custom_call.1
= control target key start
LH: loop header
LB: loop body
LE: loop exit
PB: predicated region body
PF: predicated region fallthrough
CT: control target
= control target key end

     0   :  { %7 = vsyncpa [#allocation3], 0  ;;  %s199_s0 = inlined_call_operand.hbm [shape: f32[8,8,256], index: 0, kind: input, shape index: {}]   ;;  %s200_s1 = inlined_call_operand.hbm [shape: f32[8,8,256], index: 1, kind: input, shape index: {}]   ;;  %s201_s2 = inlined_call_operand.hbm [shape: f32[8,256], index: 2, kind: output, shape index: {}]  }
   0x1   :  { %8 = vsyncpa [#allocation6], 0 }
   0x2   :  { %9 = vsyncpa [#allocation4], 0  ;;  %s15_s11 = scalar_lea.hbm %s199_s0, 1792  ;;  %s139_s12 = smov [#allocation2]  }
   0x3   :  { %s17_s13 = sshll.u32 %s139_s12, 4  ;;  %s163_s16 = scalar_lea.hbm %s200_s1, 128  ;;  %s18_s13 = int_to_ptr.vmem [resolvable:$true] %s17_s13 }
   0x4   :  { %s85_s19 = scalar_lea.hbm %s199_s0, 1920  ;;  %s63_s22 = scalar_lea.hbm %s199_s0, 2048 }
   0x5   :  { %p62_p0 = scmp.ne.s32.totalorder %s15_s11, %s85_s19  ;;  %p64_p1 = scmp.lt.u32.totalorder %s15_s11, %s199_s0 }
   0x6   :  { %p65_p2 = scmp.lt.u32.totalorder %s63_s22, %s85_s19  ;;  %p67_p4 = scmp.lt.u32.totalorder %s85_s19, %s15_s11 }
   0x8   :  { %p66_p3 = por %p65_p2, %p64_p1 }
   0xa   :  { %p68_p5 = por %p67_p4, %p66_p3 }
   0xc   :  { %p69_p6 = pnand %p68_p5, %p62_p0 }
   0xe   :  { %72 = shalt.err (!%p69_p6)
}
   0xf   :  { %s73_s25 = scalar_lea.vmem %s18_s13, 128  ;;  %p78_p8 = scmp.lt.s32.totalorder %s18_s13, %s18_s13 }
  0x10   :  { %p74_p7 = scmp.ne.s32.totalorder %s18_s13, %s73_s25  ;;  %p79_p9 = scmp.lt.s32.totalorder %s73_s25, %s73_s25 }
  0x12   :  { %p80_p10 = por %p79_p9, %p78_p8 }
  0x14   :  { %p81_p11 = pnand %p80_p10, %p74_p7 }
  0x16   :  { %84 = shalt.err (!%p81_p11)
}
  0x17   :  { %20 = dma.hbm_to_vmem [thread:$0]  %s15_s11, 128, %s18_s13, [#allocation3]  }
  0x18   :  { %s140_s26 = smov [#allocation5]   ;;  %s110_s29 = scalar_lea.hbm %s200_s1, 256 }
  0x19   :  { %s28_s27 = sshll.u32 %s140_s26, 4  ;;  %p87_p12 = scmp.ne.s32.totalorder %s163_s16, %s110_s29  ;;  %s29_s27 = int_to_ptr.vmem [resolvable:$true] %s28_s27 }
  0x1a   :  { %s88_s4 = scalar_lea.hbm %s200_s1, 2048  ;;  %p89_p13 = scmp.lt.u32.totalorder %s163_s16, %s200_s1 }
  0x1b   :  { %p90_p0 = scmp.lt.u32.totalorder %s88_s4, %s110_s29  ;;  %p92_p2 = scmp.lt.u32.totalorder %s110_s29, %s163_s16 }
  0x1d   :  { %p91_p1 = por %p90_p0, %p89_p13 }
  0x1f   :  { %p93_p3 = por %p92_p2, %p91_p1 }
  0x21   :  { %p94_p4 = pnand %p93_p3, %p87_p12 }
  0x23   :  { %97 = shalt.err (!%p94_p4)
}
  0x24   :  { %s98_s7 = scalar_lea.vmem %s29_s27, 128  ;;  %p103_p6 = scmp.lt.s32.totalorder %s29_s27, %s29_s27 }
  0x25   :  { %p99_p5 = scmp.ne.s32.totalorder %s29_s27, %s98_s7  ;;  %p104_p7 = scmp.lt.s32.totalorder %s98_s7, %s98_s7 }
  0x27   :  { %p105_p8 = por %p104_p7, %p103_p6 }
  0x29   :  { %p106_p9 = pnand %p105_p8, %p99_p5 }
  0x2b   :  { %109 = shalt.err (!%p106_p9)
}
  0x2c   :  { %31 = dma.hbm_to_vmem [thread:$0]  %s163_s16, 128, %s29_s27, [#allocation6]  }
  0x2d   :  { %133 = dma.done.wait [#allocation3], 128  }
  0x2e   :  { %134 = vsyncadd [#allocation3], 4294967168 }
  0x2f   :  { %135 = dma.done.wait [#allocation6], 128  }
  0x30   :  { %136 = vsyncadd [#allocation6], 4294967168  ;;  %s141_s1 = smov [#allocation7]   ;;  %v38_v0 = vld [vmem:[#allocation2] sm:$0xff]  ;;  %v40_v1 = vld [vmem:[#allocation5] sm:$0xff] }
  0x31   :  { %s48_s8 = sshll.u32 %s141_s1, 4  ;;  %39 = vst [vmem:[#allocation7] sm:$0xff] %v38_v0  ;;  %41 = vst [vmem:[#allocation7 + $0x8] sm:$0xff] %v40_v1  ;;  %s49_s8 = int_to_ptr.vmem [resolvable:$true] %s48_s8 }
  0x32   :  { %s111_s9 = scalar_lea.vmem %s49_s8, 256  ;;  %p116_p11 = scmp.lt.s32.totalorder %s49_s8, %s49_s8 }
  0x33   :  { %p112_p10 = scmp.ne.s32.totalorder %s49_s8, %s111_s9  ;;  %p117_p12 = scmp.lt.s32.totalorder %s111_s9, %s111_s9 }
  0x35   :  { %p118_p13 = por %p117_p12, %p116_p11 }
  0x37   :  { %p119_p0 = pnand %p118_p13, %p112_p10 }
  0x39   :  { %122 = shalt.err (!%p119_p0)
}
  0x3a   :  { %s123_s12 = scalar_lea.hbm %s201_s2, 256 }
  0x3b   :  { %p124_p1 = scmp.ne.s32.totalorder %s201_s2, %s123_s12  ;;  %p127_p2 = scmp.lt.u32.totalorder %s123_s12, %s201_s2 }
  0x3d   :  { %p129_p3 = pnand %p127_p2, %p124_p1 }
  0x3f   :  { %132 = shalt.err (!%p129_p3)
}
  0x40   :  { %51 = dma.vmem_to_hbm [thread:$0]  %s49_s8, 256, %s201_s2, [#allocation4]  }
  0x41   :  { %137 = dma.done.wait [#allocation4], 256  }
  0x42   :  { %138 = vsyncadd [#allocation4], 4294967040 }
  0x43   :  { %55 = vsyncpa [#allocation3], 1 }
  0x44   :  { %56 = vsyncpa [#allocation6], 1 }
  0x45   :  { %57 = vsyncpa [#allocation4], 1 }

</bundles_post_ra>
